<compile_context>
chip_gen: v6e
topology: v6e:2x2x1
jax: 0.10.0
libtpu: 0.0.40
codegen_flags: <defaults>
</compile_context>

<pallas_src>
import jax
import jax.numpy as jnp
from jax import lax
from jax.experimental import pallas as pl
from jax.experimental.pallas import tpu as pltpu

_VMEM_LIMIT = 48 * 1024 * 1024  # fits v7x (64 MiB physical) and is safe on v5e/v6e


# -----------------------------------------------------------------------------
# Phase 1 / 3: tiled  X @ W + b  (bias broadcast over rows), bf16 MXU / f32 acc
# -----------------------------------------------------------------------------
def matmul_bias_kernel(x_ref, w_ref, b_ref, o_ref):
    # x_ref: (tm, K) bf16   w_ref: (K, tn) bf16   b_ref: (1, tn) f32   o_ref: (tm, tn)
    acc = jnp.dot(x_ref[...], w_ref[...], preferred_element_type=jnp.float32)
    o_ref[...] = (acc + b_ref[...]).astype(o_ref.dtype)


def _matmul_bias(x, w, b, *, tm=512, tn=None, out_dtype=jnp.float32):
    """y = x @ w + b.

    tn=None : whole (K, N) RHS + bias stay VMEM-resident (constant index_map,
              fetched once), 1-D grid over row tiles.  Use when the RHS is small
              (Phase 1: W_ih).
    tn=int  : 2-D tiled; grid ordered so the operand generating the larger HBM
              re-stream traffic is fetched only once (Phase 3: big-vocab W_out).
    """
    M, K = x.shape
    N = w.shape[1]

    tm = min(tm, 8 * pl.cdiv(M, 8))
    Mp = tm * pl.cdiv(M, tm)
    xp = jnp.pad(x, ((0, Mp - M), (0, 0))) if Mp != M else x

    if tn is None:
        Np = 128 * pl.cdiv(N, 128)
        wp = jnp.pad(w, ((0, 0), (0, Np - N))) if Np != N else w
        bp = jnp.pad(b, ((0, 0), (0, Np - N))) if Np != N else b
        out = pl.pallas_call(
            matmul_bias_kernel,
            out_shape=jax.ShapeDtypeStruct((Mp, Np), out_dtype),
            grid_spec=pltpu.PrefetchScalarGridSpec(
                num_scalar_prefetch=0,
                grid=(Mp // tm,),
                in_specs=[pl.BlockSpec((tm, K), lambda i: (i, 0)),
                          pl.BlockSpec((K, Np), lambda i: (0, 0)),   # resident RHS
                          pl.BlockSpec((1, Np), lambda i: (0, 0))],  # resident bias
                out_specs=pl.BlockSpec((tm, Np), lambda i: (i, 0))),
            compiler_params=pltpu.CompilerParams(
                dimension_semantics=("parallel",),
                vmem_limit_bytes=_VMEM_LIMIT),
        )(xp, wp, bp)
    else:
        tn = min(tn, 128 * pl.cdiv(N, 128))
        Np = tn * pl.cdiv(N, tn)
        wp = jnp.pad(w, ((0, 0), (0, Np - N))) if Np != N else w
        bp = jnp.pad(b, ((0, 0), (0, Np - N))) if Np != N else b
        gm, gn = Mp // tm, Np // tn

        # Pick the grid order that minimizes re-streamed HBM bytes:
        #   m-major: W re-fetched per row block;  n-major: X re-fetched per col block.
        m_major_restream = gm * K * Np
        n_major_restream = gn * Mp * K
        if m_major_restream <= n_major_restream:
            grid = (gm, gn)
            in_specs = [pl.BlockSpec((tm, K), lambda i, j: (i, 0)),
                        pl.BlockSpec((K, tn), lambda i, j: (0, j)),
                        pl.BlockSpec((1, tn), lambda i, j: (0, j))]
            out_spec = pl.BlockSpec((tm, tn), lambda i, j: (i, j))
        else:
            grid = (gn, gm)
            in_specs = [pl.BlockSpec((tm, K), lambda j, i: (i, 0)),
                        pl.BlockSpec((K, tn), lambda j, i: (0, j)),
                        pl.BlockSpec((1, tn), lambda j, i: (0, j))]
            out_spec = pl.BlockSpec((tm, tn), lambda j, i: (i, j))

        out = pl.pallas_call(
            matmul_bias_kernel,
            out_shape=jax.ShapeDtypeStruct((Mp, Np), out_dtype),
            grid_spec=pltpu.PrefetchScalarGridSpec(
                num_scalar_prefetch=0, grid=grid,
                in_specs=in_specs, out_specs=out_spec),
            compiler_params=pltpu.CompilerParams(
                dimension_semantics=("parallel", "parallel"),
                vmem_limit_bytes=_VMEM_LIMIT),
        )(xp, wp, bp)

    if Mp != M or Np != N:
        out = out[:M, :N]
    return out


# -----------------------------------------------------------------------------
# Phase 2: LSTM recurrence (gate columns pre-reordered to i, f, o, g)
# -----------------------------------------------------------------------------
def lstm_recurrence_kernel(gx_ref, w_hh_hbm, h_out_ref, w_scr, h_scr, c_scr):
    """gx_ref   : (Tt, Bt, 4H) bf16   precomputed x_t @ W_ih + b (streamed time tile)
       w_hh_hbm : (H, 4H) bf16        raw HBM ref (pl.ANY) - copied to VMEM once
       h_out_ref: (Tt, Bt, H) bf16    hidden states for this (batch-chunk, time) tile
       w_scr    : (H, 4H) bf16 VMEM   single-buffered resident recurrent weights
       h_scr/c_scr: (Bt, H) f32 VMEM  state carried across time grid steps."""
    H = h_scr.shape[-1]
    Tt = gx_ref.shape[0]

    # First time step of each batch chunk: zero the state and pull W_hh into VMEM
    # (done per batch chunk so it also holds when the parallel axis is core-sharded).
    @pl.when(pl.program_id(1) == 0)
    def _():
        pltpu.sync_copy(w_hh_hbm, w_scr)
        h_scr[...] = jnp.zeros_like(h_scr)
        c_scr[...] = jnp.zeros_like(c_scr)

    w_hh = w_scr[...]  # hoisted load, bf16

    def step(t, carry):
        h_prev, c_prev = carry  # f32 state
        gates = gx_ref[t].astype(jnp.float32) + jnp.dot(
            h_prev.astype(jnp.bfloat16), w_hh, preferred_element_type=jnp.float32)
        # i,f,o pre-activations are contiguous -> one sigmoid over (Bt, 3H),
        # computed via tanh so only one EUP push per element.
        sig = 0.5 * (jnp.tanh(0.5 * gates[:, :3 * H]) + 1.0)
        i_g = sig[:, 0 * H:1 * H]
        f_g = sig[:, 1 * H:2 * H]
        o_g = sig[:, 2 * H:3 * H]
        g_g = jnp.tanh(gates[:, 3 * H:4 * H])
        c_new = f_g * c_prev + i_g * g_g
        h_new = o_g * jnp.tanh(c_new)
        h_out_ref[t] = h_new.astype(h_out_ref.dtype)
        return (h_new, c_new)

    # h/c carried as loop values; unrolled for LLO scheduling visibility.
    h_fin, c_fin = lax.fori_loop(0, Tt, step, (h_scr[...], c_scr[...]), unroll=True)
    h_scr[...] = h_fin
    c_scr[...] = c_fin


def _lstm_recurrence(gates_x, w_hh_bf16, *, out_dtype=jnp.bfloat16):
    """gates_x: (T, B, 4H) bf16 -> h_seq: (T, B, H) out_dtype.

    NOTE: padded trailing time steps (Tp > T) still run LSTM math and update the
    internal h/c scratch; outputs are sliced so logits are exact, but final (h,c)
    state must not be read from this kernel (it is not returned)."""
    T, B, G = gates_x.shape
    H = w_hh_bf16.shape[0]

    # vreg-friendly batch (f32 sublanes = 8); optional batch-parallel axis so both
    # v7x TensorCores work during the otherwise-serial recurrence.
    Bp = 8 * pl.cdiv(B, 8)
    nb = 2 if Bp >= 16 else 1
    Bt = Bp // nb
    if Bt % 8 != 0:
        nb, Bt = 1, Bp

    # Time tile: as large as a ~24 MiB double-buffered streaming budget allows.
    per_step_bytes = 2 * Bt * (G + H)          # bf16 gates-in + bf16 h-out per step
    tt = max(1, min(64, (24 * 1024 * 1024) // (2 * per_step_bytes)))
    tt = min(tt, T)
    Tp = tt * pl.cdiv(T, tt)

    gx = gates_x
    if Bp != B or Tp != T:
        gx = jnp.pad(gx, ((0, Tp - T), (0, Bp - B), (0, 0)))

    h_seq = pl.pallas_call(
        lstm_recurrence_kernel,
        out_shape=jax.ShapeDtypeStruct((Tp, Bp, H), out_dtype),
        grid_spec=pltpu.PrefetchScalarGridSpec(
            num_scalar_prefetch=0,
            grid=(nb, Tp // tt),
            in_specs=[pl.BlockSpec((tt, Bt, G), lambda b, t: (t, b, 0)),
                      pl.BlockSpec(memory_space=pl.ANY)],   # W_hh stays in HBM
            out_specs=pl.BlockSpec((tt, Bt, H), lambda b, t: (t, b, 0)),
            scratch_shapes=[pltpu.VMEM((H, G), jnp.bfloat16),   # resident W_hh (1 copy)
                            pltpu.VMEM((Bt, H), jnp.float32),   # h state
                            pltpu.VMEM((Bt, H), jnp.float32)]), # c state
        compiler_params=pltpu.CompilerParams(
            dimension_semantics=("parallel", "arbitrary"),
            vmem_limit_bytes=_VMEM_LIMIT),
    )(gx, w_hh_bf16)

    if Bp != B or Tp != T:
        h_seq = h_seq[:T, :B, :]
    return h_seq


# -----------------------------------------------------------------------------
# Full forward (matches LM_LSTM.forward, eval mode)
# -----------------------------------------------------------------------------
def _reorder_gates(w):
    """(..., 4H) columns from PyTorch order (i,f,g,o) to (i,f,o,g)."""
    i, f, g, o = jnp.split(w, 4, axis=-1)
    return jnp.concatenate([i, f, o, g], axis=-1)


def lm_lstm_forward(token_ids, params):
    """token_ids: (B, T) int32.  Returns logits (B, V, T) like the PyTorch module."""
    emb_table = params["embedding"]           # (V, E), row pad_index is zero
    w_ih, w_hh, b = params["w_ih"], params["w_hh"], params["b"]   # (E,4H),(H,4H),(1,4H)
    w_out, b_out = params["w_out"], params["b_out"]               # (H,V),(1,V)

    B, T = token_ids.shape
    E = emb_table.shape[1]
    H = w_hh.shape[0]
    V = w_out.shape[1]

    # Gate-column reorder (i,f,g,o)->(i,f,o,g) so the kernel does one contiguous sigmoid.
    w_ih_r, w_hh_r, b_r = _reorder_gates(w_ih), _reorder_gates(w_hh), _reorder_gates(b)

    # bf16 MXU operands / streamed intermediates; f32 accumulation + f32 h/c state.
    emb_bf = emb_table.astype(jnp.bfloat16)
    w_ih_bf = w_ih_r.astype(jnp.bfloat16)
    w_hh_bf = w_hh_r.astype(jnp.bfloat16)
    w_out_bf = w_out.astype(jnp.bfloat16)

    # Embedding gather directly in time-major order: transpose the (B,T) int ids,
    # not the (B,T,E) activation tensor.
    # TODO(synk): emb_dropout / out_dropout are identity (eval); add PRNG masks for training.
    emb_t = jnp.take(emb_bf, token_ids.T, axis=0)                  # (T, B, E) bf16

    # Phase 1: batched input projection, W_ih resident, one streaming pass over rows.
    gates_x = _matmul_bias(emb_t.reshape(T * B, E), w_ih_bf, b_r,
                           tm=512, tn=None, out_dtype=jnp.bfloat16)
    gates_x = gates_x.reshape(T, B, 4 * H)

    # Phase 2: serial LSTM recurrence (time streamed, batch-parallel for megacore).
    h_seq = _lstm_recurrence(gates_x, w_hh_bf)                     # (T, B, H) bf16

    # Phase 3: batched output projection over the vocab (lane-dense, 512x512 tiles).
    logits = _matmul_bias(h_seq.reshape(T * B, H), w_out_bf, b_out,
                          tm=512, tn=512, out_dtype=jnp.float32)
    logits = logits.reshape(T, B, V)

    return jnp.transpose(logits, (1, 2, 0))                        # (B, V, T)


# -----------------------------------------------------------------------------
# Pure-JAX f32 reference (lax.scan LSTM) for correctness checking
# -----------------------------------------------------------------------------
def lm_lstm_reference(token_ids, params):
    emb_table = params["embedding"]
    w_ih, w_hh, b = params["w_ih"], params["w_hh"], params["b"]
    w_out, b_out = params["w_out"], params["b_out"]
    H = w_hh.shape[0]

    emb = jnp.take(emb_table, token_ids, axis=0)            # (B, T, E)
    B, T, E = emb.shape

    def cell(carry, x_t):
        h, c = carry
        gates = x_t @ w_ih + h @ w_hh + b[0]
        i = jax.nn.sigmoid(gates[:, 0 * H:1 * H])
        f = jax.nn.sigmoid(gates[:, 1 * H:2 * H])
        g = jnp.tanh(gates[:, 2 * H:3 * H])
        o = jax.nn.sigmoid(gates[:, 3 * H:4 * H])
        c = f * c + i * g
        h = o * jnp.tanh(c)
        return (h, c), h

    h0 = jnp.zeros((B, H), jnp.float32)
    c0 = jnp.zeros((B, H), jnp.float32)
    _, hs = lax.scan(cell, (h0, c0), jnp.transpose(emb, (1, 0, 2)))  # (T, B, H)
    lstm_out = jnp.transpose(hs, (1, 0, 2))                  # (B, T, H)
    logits = lstm_out @ w_out + b_out[0]                     # (B, T, V)
    return jnp.transpose(logits, (0, 2, 1))                  # (B, V, T)


def init_params(key, emb_size, hidden_size, output_size, pad_index=0):
    ks = jax.random.split(key, 6)
    scale = 1.0 / jnp.sqrt(hidden_size)
    embedding = jax.random.normal(ks[0], (output_size, emb_size), jnp.float32) * 0.1
    embedding = embedding.at[pad_index].set(0.0)             # padding_idx semantics
    w_ih = jax.random.uniform(ks[1], (emb_size, 4 * hidden_size), jnp.float32, -scale, scale)
    w_hh = jax.random.uniform(ks[2], (hidden_size, 4 * hidden_size), jnp.float32, -scale, scale)
    b_ih = jax.random.uniform(ks[3], (4 * hidden_size,), jnp.float32, -scale, scale)
    b_hh = jax.random.uniform(ks[4], (4 * hidden_size,), jnp.float32, -scale, scale)
    w_out = jax.random.uniform(ks[5], (hidden_size, output_size), jnp.float32, -scale, scale)
    b_out = jnp.zeros((output_size,), jnp.float32)
    return {
        "embedding": embedding,
        "w_ih": w_ih,
        "w_hh": w_hh,
        "b": (b_ih + b_hh).reshape(1, -1),
        "w_out": w_out,
        "b_out": b_out.reshape(1, -1),
    }


if __name__ == "__main__":
    # Small but layout-aligned shapes (B multiple of 8, E/H/V multiples of 128)
    # so gate slices are full-width vregs and output stores are unmasked.
    B, T, E, H, V = 8, 16, 128, 128, 256
    key = jax.random.PRNGKey(0)
    k_param, k_tok = jax.random.split(key)
    params = init_params(k_param, emb_size=E, hidden_size=H, output_size=V, pad_index=0)
    token_ids = jax.random.randint(k_tok, (B, T), 0, V, dtype=jnp.int32)

    logits = jax.block_until_ready(lm_lstm_forward(token_ids, params))
    assert logits.shape == (B, V, T), logits.shape

    ref = lm_lstm_reference(token_ids, params)
    # bf16 MXU operands + bf16 streamed intermediates (f32 accumulation / state):
    # relaxed tolerance vs the pure-f32 reference.
    err = float(jnp.max(jnp.abs(logits - ref)))
    assert err < 5e-2, f"mismatch vs JAX reference: max abs err {err}"

    print("KERNEL_OK")
</pallas_src>

<mosaic_0001>
module attributes {stable_mosaic.version = 11 : i64} {
  func.func @matmul_bias_kernel(%arg0: i32, %arg1: memref<128x128xbf16, #tpu.memory_space<vmem>>, %arg2: memref<128x512xbf16, #tpu.memory_space<vmem>>, %arg3: memref<1x512xf32, #tpu.memory_space<vmem>>, %arg4: memref<128x512xbf16, #tpu.memory_space<vmem>>) attributes {dimension_semantics = [#tpu.dimension_semantics<parallel>], iteration_bounds = array<i64: 1>, scalar_prefetch = 0 : i64, scratch_operands = 0 : i64, tpu.core_type = #tpu.core_type<tc>, window_params = [{transform_indices = @transform_0, window_bounds = array<i64: 128, 128>}, {pipeline_mode = #tpu.pipeline_mode<synchronous>, transform_indices = @transform_1, window_bounds = array<i64: 128, 512>}, {pipeline_mode = #tpu.pipeline_mode<synchronous>, transform_indices = @transform_2, window_bounds = array<i64: 1, 512>}, {transform_indices = @transform_3, window_bounds = array<i64: 128, 512>}]} {
    %c0 = arith.constant 0 : index
    %c0_0 = arith.constant 0 : index
    %0 = vector.load %arg1[%c0, %c0_0] : memref<128x128xbf16, #tpu.memory_space<vmem>>, vector<128x128xbf16>
    %c0_1 = arith.constant 0 : index
    %c0_2 = arith.constant 0 : index
    %1 = vector.load %arg2[%c0_1, %c0_2] : memref<128x512xbf16, #tpu.memory_space<vmem>>, vector<128x512xbf16>
    %cst = arith.constant dense<0.000000e+00> : vector<128x512xf32>
    %2 = tpu.matmul %0, %1, %cst {dimension_numbers = #tpu.dot_dimension_numbers<[1], [0], [0], [1], [0, 0, 1, 1], [], []>} : vector<128x128xbf16>, vector<128x512xbf16>, vector<128x512xf32> -> vector<128x512xf32>
    %c0_3 = arith.constant 0 : index
    %c0_4 = arith.constant 0 : index
    %3 = vector.load %arg3[%c0_3, %c0_4] : memref<1x512xf32, #tpu.memory_space<vmem>>, vector<1x512xf32>
    %4 = vector.broadcast %3 : vector<1x512xf32> to vector<128x512xf32>
    %5 = arith.addf %2, %4 : vector<128x512xf32>
    %6 = arith.truncf %5 : vector<128x512xf32> to vector<128x512xbf16>
    %c0_5 = arith.constant 0 : index
    %c0_6 = arith.constant 0 : index
    %7 = vector.load %arg4[%c0_5, %c0_6] : memref<128x512xbf16, #tpu.memory_space<vmem>>, vector<128x512xbf16>
    tpu.vector_store %arg4[%c0_5, %c0_6], %6 {strides = array<i32>} : memref<128x512xbf16, #tpu.memory_space<vmem>>, vector<128x512xbf16>,
    return
  }
  func.func @transform_0(%arg0: i32) -> (i32, i32) {
    %c0_i32 = arith.constant 0 : i32
    %c0_i32_0 = arith.constant 0 : i32
    return %arg0, %c0_i32 : i32, i32
  }
  func.func @transform_1(%arg0: i32) -> (i32, i32) {
    %c0_i32 = arith.constant 0 : i32
    %c0_i32_0 = arith.constant 0 : i32
    %c0_i32_1 = arith.constant 0 : i32
    return %c0_i32, %c0_i32_0 : i32, i32
  }
  func.func @transform_2(%arg0: i32) -> (i32, i32) {
    %c0_i32 = arith.constant 0 : i32
    %c0_i32_0 = arith.constant 0 : i32
    %c0_i32_1 = arith.constant 0 : i32
    return %c0_i32, %c0_i32_0 : i32, i32
  }
  func.func @transform_3(%arg0: i32) -> (i32, i32) {
    %c0_i32 = arith.constant 0 : i32
    %c0_i32_0 = arith.constant 0 : i32
    return %arg0, %c0_i32 : i32, i32
  }
}

</mosaic_0001>

<bundles_post_ra>
// kernel: tpu_custom_call.1
= control target key start
LH: loop header
LB: loop body
LE: loop exit
PB: predicated region body
PF: predicated region fallthrough
CT: control target
= control target key end

     0   :  { %8 = vsyncpa [#allocation3], 0  ;;  %s1191_s0 = inlined_call_operand.hbm [shape: bf16[128,128], index: 0, kind: input, shape index: {}]   ;;  %s1192_s1 = inlined_call_operand.hbm [shape: bf16[128,512], index: 1, kind: input, shape index: {}]   ;;  %s1193_s2 = inlined_call_operand.hbm [shape: f32[1,512], index: 2, kind: input, shape index: {}]   ;;  %s1194_s3 = inlined_call_operand.hbm [shape: bf16[128,512], index: 3, kind: output, shape index: {}]  }
   0x1   :  { %9 = vsyncpa [#allocation6], 0 }
   0x2   :  { %10 = vsyncpa [#allocation4], 0  ;;  %s1056_s12 = smov [#allocation5]  }
   0x3   :  { %s28_s13 = sshll.u32 %s1056_s12, 4  ;;  %s29_s13 = int_to_ptr.vmem [resolvable:$true] %s28_s13 }
   0x4   :  { %s978_s14 = scalar_lea.vmem %s29_s13, 4096  ;;  %p983_p1 = scmp.lt.s32.totalorder %s29_s13, %s29_s13 }
   0x5   :  { %p979_p0 = scmp.ne.s32.totalorder %s29_s13, %s978_s14  ;;  %p984_p2 = scmp.lt.s32.totalorder %s978_s14, %s978_s14 }
   0x7   :  { %p985_p3 = por %p984_p2, %p983_p1 }
   0x9   :  { %p986_p4 = pnand %p985_p3, %p979_p0 }
   0xb   :  { %989 = shalt.err (!%p986_p4)
}
   0xc   :  { %s1057_s15 = smov 256   ;;  %s1058_s16 = smov 16  }
   0xd   :  { %34 = dma.hbm_to_vmem [thread:$0]  %s1192_s1, 4096, %s29_s13, [#allocation6], %s1057_s15, %s1057_s15, %s1058_s16  }
   0xe   :  { %s1059_s19 = smov [#allocation2]  }
   0xf   :  { %s16_s20 = sshll.u32 %s1059_s19, 4  ;;  %s17_s20 = int_to_ptr.vmem [resolvable:$true] %s16_s20 }
  0x10   :  { %s998_s21 = scalar_lea.vmem %s17_s20, 1024  ;;  %p1003_p6 = scmp.lt.s32.totalorder %s17_s20, %s17_s20 }
  0x11   :  { %p999_p5 = scmp.ne.s32.totalorder %s17_s20, %s998_s21  ;;  %p1004_p7 = scmp.lt.s32.totalorder %s998_s21, %s998_s21 }
  0x13   :  { %p1005_p8 = por %p1004_p7, %p1003_p6 }
  0x15   :  { %p1006_p9 = pnand %p1005_p8, %p999_p5 }
  0x17   :  { %1009 = shalt.err (!%p1006_p9)
}
  0x18   :  { %s1060_s22 = smov 64   ;;  %s1061_s23 = smov 4  }
  0x19   :  { %22 = dma.hbm_to_vmem [thread:$0]  %s1191_s0, 1024, %s17_s20, [#allocation3], %s1060_s22, %s1060_s22, %s1061_s23  }
  0x1a   :  { %s1062_s26 = smov [#allocation7]  }
  0x1b   :  { %s41_s27 = sshll.u32 %s1062_s26, 4  ;;  %s42_s27 = int_to_ptr.vmem [resolvable:$true] %s41_s27 }
  0x1c   :  { %s1018_s1 = scalar_lea.vmem %s42_s27, 64  ;;  %p1023_p11 = scmp.lt.s32.totalorder %s42_s27, %s42_s27 }
  0x1d   :  { %p1019_p10 = scmp.ne.s32.totalorder %s42_s27, %s1018_s1  ;;  %p1024_p12 = scmp.lt.s32.totalorder %s1018_s1, %s1018_s1 }
  0x1f   :  { %p1025_p13 = por %p1024_p12, %p1023_p11 }
  0x21   :  { %p1026_p0 = pnand %p1025_p13, %p1019_p10 }
  0x23   :  { %1029 = shalt.err (!%p1026_p0)
}
  0x24   :  { %44 = dma.hbm_to_vmem [thread:$0]  %s1193_s2, 64, %s42_s27, [#allocation6]  }
  0x25   :  { %1050 = dma.done.wait [#allocation3], 1024  }
  0x26   :  { %1051 = vsyncadd [#allocation3], 4294966272 }
  0x27   :  { %1052 = dma.done.wait [#allocation6], 4160  }
  0x28   :  { %1053 = vsyncadd [#allocation6], 4294963136  ;;  %v1063_v0 = vmov 0   ;;  %v914_v1 = vld [vmem:[#allocation5 + $0xe4] ss:$16 sps:$4 sm:$0xff]   ;;  %v963_v34 = vld [vmem:[#allocation2 + $0x8] sm:$0xff]   ;;  %v105_v41 = vlaneseq }
  0x29   :  { %365 = vmatprep.mubr.bf16.mxu0 %v1063_v0  ;;  %478 = vmatprep.mubr.bf16.mxu1 %v1063_v0  ;;  %v916_v2 = vld [vmem:[#allocation5 + $0xec] ss:$16 sps:$4 sm:$0xff]   ;;  %v918_v3 = vld [vmem:[#allocation5 + $0xe0] ss:$16 sps:$4 sm:$0xff]   ;;  %v919_v4 = vld [vmem:[#allocation5 + $0xe8] ss:$16 sps:$4 sm:$0xff]  }
  0x2a   :  { %333 = vmatprep.subr.bf16.mxu0 %v914_v1  ;;  %446 = vmatprep.subr.bf16.mxu1 %v916_v2  ;;  %v920_v5 = vld [vmem:[#allocation5 + $0xc4] ss:$16 sps:$4 sm:$0xff]   ;;  %v922_v6 = vld [vmem:[#allocation5 + $0xcc] ss:$16 sps:$4 sm:$0xff]   ;;  %v924_v7 = vld [vmem:[#allocation5 + $0xc0] ss:$16 sps:$4 sm:$0xff]  }
  0x2b   :  { %334 = vmatpush1.bf16.msra.mxu0 %v918_v3  ;;  %447 = vmatpush1.bf16.msra.mxu1 %v919_v4  ;;  %v925_v8 = vld [vmem:[#allocation5 + $0xc8] ss:$16 sps:$4 sm:$0xff]   ;;  %v926_v9 = vld [vmem:[#allocation5 + $0xa4] ss:$16 sps:$4 sm:$0xff]   ;;  %v928_v10 = vld [vmem:[#allocation5 + $0xac] ss:$16 sps:$4 sm:$0xff]  }
  0x2c   :  { %335 = vmatprep.subr.bf16.mxu0 %v920_v5  ;;  %448 = vmatprep.subr.bf16.mxu1 %v922_v6  ;;  %v930_v11 = vld [vmem:[#allocation5 + $0xa0] ss:$16 sps:$4 sm:$0xff]   ;;  %v931_v12 = vld [vmem:[#allocation5 + $0xa8] ss:$16 sps:$4 sm:$0xff]   ;;  %v932_v13 = vld [vmem:[#allocation5 + $0x84] ss:$16 sps:$4 sm:$0xff]  }
  0x2d   :  { %v934_v14 = vld [vmem:[#allocation5 + $0x8c] ss:$16 sps:$4 sm:$0xff]   ;;  %v936_v15 = vld [vmem:[#allocation5 + $0x80] ss:$16 sps:$4 sm:$0xff]   ;;  %v937_v16 = vld [vmem:[#allocation5 + $0x88] ss:$16 sps:$4 sm:$0xff]  }
  0x2e   :  { %v938_v17 = vld [vmem:[#allocation5 + $0x64] ss:$16 sps:$4 sm:$0xff]   ;;  %v940_v18 = vld [vmem:[#allocation5 + $0x6c] ss:$16 sps:$4 sm:$0xff]   ;;  %v942_v19 = vld [vmem:[#allocation5 + $0x60] ss:$16 sps:$4 sm:$0xff]  }
  0x2f   :  { %336 = vmatpush1.bf16.msra.mxu0 %v924_v7  ;;  %449 = vmatpush1.bf16.msra.mxu1 %v925_v8  ;;  %v943_v20 = vld [vmem:[#allocation5 + $0x68] ss:$16 sps:$4 sm:$0xff]   ;;  %v944_v21 = vld [vmem:[#allocation5 + $0x44] ss:$16 sps:$4 sm:$0xff]   ;;  %v946_v22 = vld [vmem:[#allocation5 + $0x4c] ss:$16 sps:$4 sm:$0xff]  }
  0x30   :  { %337 = vmatprep.subr.bf16.mxu0 %v926_v9  ;;  %450 = vmatprep.subr.bf16.mxu1 %v928_v10  ;;  %v948_v23 = vld [vmem:[#allocation5 + $0x40] ss:$16 sps:$4 sm:$0xff]   ;;  %v949_v24 = vld [vmem:[#allocation5 + $0x48] ss:$16 sps:$4 sm:$0xff]   ;;  %v950_v25 = vld [vmem:[#allocation5 + $0x24] ss:$16 sps:$4 sm:$0xff]  }
  0x31   :  { %v952_v26 = vld [vmem:[#allocation5 + $0x2c] ss:$16 sps:$4 sm:$0xff]   ;;  %v954_v27 = vld [vmem:[#allocation5 + $0x20] ss:$16 sps:$4 sm:$0xff]   ;;  %v955_v28 = vld [vmem:[#allocation5 + $0x28] ss:$16 sps:$4 sm:$0xff]  }
  0x32   :  { %v956_v29 = vld [vmem:[#allocation5 + $0x4] ss:$16 sps:$4 sm:$0xff]   ;;  %v958_v30 = vld [vmem:[#allocation5 + $0xc] ss:$16 sps:$4 sm:$0xff]   ;;  %v960_v31 = vld [vmem:[#allocation5] ss:$16 sps:$4 sm:$0xff]  }
  0x33   :  { %338 = vmatpush1.bf16.msra.mxu0 %v930_v11  ;;  %451 = vmatpush1.bf16.msra.mxu1 %v931_v12  ;;  %v961_v32 = vld [vmem:[#allocation5 + $0x8] ss:$16 sps:$4 sm:$0xff]   ;;  %v962_v33 = vld [vmem:[#allocation2] sm:$0xff]   ;;  %v964_v35 = vld [vmem:[#allocation2 + $0x10] sm:$0xff]   ;;  %v106_v42 = vshrl.u32 %v105_v41, 7  ;;  %s1064_s0 = smov [#allocation8]  }
  0x34   :  { %339 = vmatprep.subr.bf16.mxu0 %v932_v13  ;;  %452 = vmatprep.subr.bf16.mxu1 %v934_v14  ;;  %v965_v36 = vld [vmem:[#allocation2 + $0x18] sm:$0xff]   ;;  %v966_v37 = vld [vmem:[#allocation2 + $0x20] sm:$0xff]   ;;  %v967_v38 = vld [vmem:[#allocation2 + $0x28] sm:$0xff]   ;;  %s788_s2 = sshll.u32 %s1064_s0, 4  ;;  %s789_s2 = int_to_ptr.vmem [resolvable:$true] %s788_s2 }
  0x35   :  { %v968_v39 = vld [vmem:[#allocation2 + $0x30] sm:$0xff]   ;;  %v969_v40 = vld [vmem:[#allocation2 + $0x38] sm:$0xff]   ;;  %v107_v43 = vsub.s32 0, %v106_v42  ;;  %v115_v44 = vsub.s32 2, %v106_v42  ;;  %v111_v45 = vsub.s32 1, %v106_v42  ;;  %v119_v46 = vsub.s32 3, %v106_v42  ;;  %p1035_p2 = scmp.lt.s32.totalorder %s789_s2, %s789_s2 }
  0x36   :  { %v103_v47 = vld [vmem:[#allocation7] sm:$0xf]  ;;  %s1030_s30 = scalar_lea.vmem %s789_s2, 4096 }
  0x37   :  { %340 = vmatpush1.bf16.msra.mxu0 %v936_v15  ;;  %453 = vmatpush1.bf16.msra.mxu1 %v937_v16  ;;  %v1113_v48 = vrot.slane %v103_v47, %v107_v43  ;;  %v1115_v49 = vrot.slane %v103_v47, %v115_v44  ;;  %v1117_v50 = vrot.slane %v103_v47, %v111_v45  ;;  %p1031_p1 = scmp.ne.s32.totalorder %s789_s2, %s1030_s30  ;;  %p1036_p3 = scmp.lt.s32.totalorder %s1030_s30, %s1030_s30 }
  0x38   :  { %341 = vmatprep.subr.bf16.mxu0 %v938_v17  ;;  %454 = vmatprep.subr.bf16.mxu1 %v940_v18  ;;  %v1119_v51 = vrot.slane %v103_v47, %v119_v46 }
  0x39   :  { %p1037_p4 = por %p1036_p3, %p1035_p2 }
  0x3b   :  { %342 = vmatpush1.bf16.msra.mxu0 %v942_v19  ;;  %455 = vmatpush1.bf16.msra.mxu1 %v943_v20  ;;  %p1038_p5 = pnand %p1037_p4, %p1031_p1 }
  0x3c   :  { %343 = vmatprep.subr.bf16.mxu0 %v944_v21  ;;  %456 = vmatprep.subr.bf16.mxu1 %v946_v22 }
  0x3f   :  { %344 = vmatpush1.bf16.msra.mxu0 %v948_v23  ;;  %457 = vmatpush1.bf16.msra.mxu1 %v949_v24 }
  0x40   :  { %345 = vmatprep.subr.bf16.mxu0 %v950_v25  ;;  %458 = vmatprep.subr.bf16.mxu1 %v952_v26 }
  0x43   :  { %346 = vmatpush1.bf16.msra.mxu0 %v954_v27  ;;  %459 = vmatpush1.bf16.msra.mxu1 %v955_v28 }
  0x44   :  { %347 = vmatprep.subr.bf16.mxu0 %v956_v29  ;;  %460 = vmatprep.subr.bf16.mxu1 %v958_v30 }
  0x47   :  { %348 = vmatpush1.bf16.msra.mxu0 %v960_v31  ;;  %461 = vmatpush1.bf16.msra.mxu1 %v961_v32 }
  0x4a   :  { %366 = vmatmul.mubr.bf16.vlgmr.msra.gmra.mxu0 %v962_v33  ;;  %479 = vmatmul.mubr.bf16.vlgmr.msra.gmra.mxu1 %v962_v33 }
  0x4b   :  { %375 = vmatprep.mubr.bf16.mxu0 %v1063_v0  ;;  %488 = vmatprep.mubr.bf16.mxu1 %v1063_v0 }
  0x52   :  { %376 = vmatmul.mubr.bf16.gmra.mxu0 %v963_v34  ;;  %489 = vmatmul.mubr.bf16.gmra.mxu1 %v963_v34 }
  0x53   :  { %385 = vmatprep.mubr.bf16.mxu0 %v1063_v0  ;;  %498 = vmatprep.mubr.bf16.mxu1 %v1063_v0 }
  0x5a   :  { %386 = vmatmul.mubr.bf16.gmra.mxu0 %v964_v35  ;;  %499 = vmatmul.mubr.bf16.gmra.mxu1 %v964_v35 }
  0x5b   :  { %395 = vmatprep.mubr.bf16.mxu0 %v1063_v0  ;;  %508 = vmatprep.mubr.bf16.mxu1 %v1063_v0 }
  0x62   :  { %396 = vmatmul.mubr.bf16.gmra.mxu0 %v965_v36  ;;  %509 = vmatmul.mubr.bf16.gmra.mxu1 %v965_v36 }
  0x63   :  { %405 = vmatprep.mubr.bf16.mxu0 %v1063_v0  ;;  %518 = vmatprep.mubr.bf16.mxu1 %v1063_v0 }
  0x6a   :  { %406 = vmatmul.mubr.bf16.gmra.mxu0 %v966_v37  ;;  %519 = vmatmul.mubr.bf16.gmra.mxu1 %v966_v37 }
  0x6b   :  { %415 = vmatprep.mubr.bf16.mxu0 %v1063_v0  ;;  %528 = vmatprep.mubr.bf16.mxu1 %v1063_v0 }
  0x72   :  { %416 = vmatmul.mubr.bf16.gmra.mxu0 %v967_v38  ;;  %529 = vmatmul.mubr.bf16.gmra.mxu1 %v967_v38 }
  0x73   :  { %425 = vmatprep.mubr.bf16.mxu0 %v1063_v0  ;;  %538 = vmatprep.mubr.bf16.mxu1 %v1063_v0 }
  0x7a   :  { %426 = vmatmul.mubr.bf16.gmra.mxu0 %v968_v39  ;;  %539 = vmatmul.mubr.bf16.gmra.mxu1 %v968_v39 }
  0x7b   :  { %435 = vmatprep.mubr.bf16.mxu0 %v1063_v0  ;;  %548 = vmatprep.mubr.bf16.mxu1 %v1063_v0 }
  0x82   :  { %436 = vmatmul.mubr.bf16.gmra.mxu0 %v969_v40  ;;  %549 = vmatmul.mubr.bf16.gmra.mxu1 %v969_v40 }
 0x10a   :  { %v367_v52 = vpop.f32.mrf.mxu0  ;;  %v480_v53 = vpop.f32.mrf.mxu1 }
 0x10b   :  { %v368_v56 = vadd.f32 %v367_v52, %v1113_v48  ;;  %v481_v57 = vadd.f32 %v480_v53, %v1115_v49 }
 0x10c   :  { %v369_v54 = vpop.f32.mrf.mxu0  ;;  %v482_v55 = vpop.f32.mrf.mxu1 }
 0x10d   :  { %v370_v58 = vadd.f32 %v369_v54, %v1117_v50  ;;  %v483_v59 = vadd.f32 %v482_v55, %v1119_v51 }
 0x10e   :  { %v371_v60 = vpop.f32.mrf.mxu0  ;;  %v484_v61 = vpop.f32.mrf.mxu1 }
 0x10f   :  { %v873_v62 = vpack.c.bf16 %v370_v58, %v368_v56  ;;  %v874_v63 = vpack.c.bf16 %v483_v59, %v481_v57  ;;  %v372_v2 = vadd.f32 %v371_v60, %v1113_v48  ;;  %v485_v3 = vadd.f32 %v484_v61, %v1115_v49 }
 0x110   :  { %v373_v0 = vpop.f32.mrf.mxu0  ;;  %v486_v1 = vpop.f32.mrf.mxu1 }
 0x111   :  { %751 = vst [vmem:[#allocation8] sm:$0xff] %v873_v62  ;;  %752 = vst [vmem:[#allocation8 + $0x8] sm:$0xff] %v874_v63  ;;  %v374_v4 = vadd.f32 %v373_v0, %v1117_v50  ;;  %v487_v5 = vadd.f32 %v486_v1, %v1119_v51 }
 0x112   :  { %v377_v6 = vpop.f32.mrf.mxu0  ;;  %v490_v7 = vpop.f32.mrf.mxu1 }
 0x113   :  { %v875_v8 = vpack.c.bf16 %v374_v4, %v372_v2  ;;  %v876_v9 = vpack.c.bf16 %v487_v5, %v485_v3  ;;  %v378_v12 = vadd.f32 %v377_v6, %v1113_v48  ;;  %v491_v13 = vadd.f32 %v490_v7, %v1115_v49 }
 0x114   :  { %v379_v10 = vpop.f32.mrf.mxu0  ;;  %v492_v11 = vpop.f32.mrf.mxu1 }
 0x115   :  { %753 = vst [vmem:[#allocation8 + $0x10] sm:$0xff] %v875_v8  ;;  %754 = vst [vmem:[#allocation8 + $0x18] sm:$0xff] %v876_v9  ;;  %v380_v14 = vadd.f32 %v379_v10, %v1117_v50  ;;  %v493_v15 = vadd.f32 %v492_v11, %v1119_v51 }
 0x116   :  { %v381_v16 = vpop.f32.mrf.mxu0  ;;  %v494_v17 = vpop.f32.mrf.mxu1 }
 0x117   :  { %v877_v18 = vpack.c.bf16 %v380_v14, %v378_v12  ;;  %v878_v19 = vpack.c.bf16 %v493_v15, %v491_v13  ;;  %v382_v22 = vadd.f32 %v381_v16, %v1113_v48  ;;  %v495_v23 = vadd.f32 %v494_v17, %v1115_v49 }
 0x118   :  { %v383_v20 = vpop.f32.mrf.mxu0  ;;  %v496_v21 = vpop.f32.mrf.mxu1 }
 0x119   :  { %755 = vst [vmem:[#allocation8 + $0x20] sm:$0xff] %v877_v18  ;;  %756 = vst [vmem:[#allocation8 + $0x28] sm:$0xff] %v878_v19  ;;  %v384_v24 = vadd.f32 %v383_v20, %v1117_v50  ;;  %v497_v25 = vadd.f32 %v496_v21, %v1119_v51 }
 0x11a   :  { %v387_v26 = vpop.f32.mrf.mxu0  ;;  %v500_v27 = vpop.f32.mrf.mxu1 }
 0x11b   :  { %v879_v28 = vpack.c.bf16 %v384_v24, %v382_v22  ;;  %v880_v29 = vpack.c.bf16 %v497_v25, %v495_v23  ;;  %v388_v32 = vadd.f32 %v387_v26, %v1113_v48  ;;  %v501_v33 = vadd.f32 %v500_v27, %v1115_v49 }
 0x11c   :  { %v389_v30 = vpop.f32.mrf.mxu0  ;;  %v502_v31 = vpop.f32.mrf.mxu1 }
 0x11d   :  { %757 = vst [vmem:[#allocation8 + $0x30] sm:$0xff] %v879_v28  ;;  %758 = vst [vmem:[#allocation8 + $0x38] sm:$0xff] %v880_v29  ;;  %v390_v34 = vadd.f32 %v389_v30, %v1117_v50  ;;  %v503_v35 = vadd.f32 %v502_v31, %v1119_v51 }
 0x11e   :  { %v391_v36 = vpop.f32.mrf.mxu0  ;;  %v504_v37 = vpop.f32.mrf.mxu1 }
 0x11f   :  { %v881_v38 = vpack.c.bf16 %v390_v34, %v388_v32  ;;  %v882_v39 = vpack.c.bf16 %v503_v35, %v501_v33  ;;  %v392_v42 = vadd.f32 %v391_v36, %v1113_v48  ;;  %v505_v43 = vadd.f32 %v504_v37, %v1115_v49 }
 0x120   :  { %v393_v40 = vpop.f32.mrf.mxu0  ;;  %v506_v41 = vpop.f32.mrf.mxu1 }
 0x121   :  { %759 = vst [vmem:[#allocation8 + $0x40] sm:$0xff] %v881_v38  ;;  %760 = vst [vmem:[#allocation8 + $0x48] sm:$0xff] %v882_v39  ;;  %v394_v44 = vadd.f32 %v393_v40, %v1117_v50  ;;  %v507_v45 = vadd.f32 %v506_v41, %v1119_v51 }
 0x122   :  { %v397_v46 = vpop.f32.mrf.mxu0  ;;  %v510_v47 = vpop.f32.mrf.mxu1 }
 0x123   :  { %v883_v52 = vpack.c.bf16 %v394_v44, %v392_v42  ;;  %v884_v53 = vpack.c.bf16 %v507_v45, %v505_v43  ;;  %v398_v56 = vadd.f32 %v397_v46, %v1113_v48  ;;  %v511_v57 = vadd.f32 %v510_v47, %v1115_v49 }
 0x124   :  { %v399_v54 = vpop.f32.mrf.mxu0  ;;  %v512_v55 = vpop.f32.mrf.mxu1 }
 0x125   :  { %761 = vst [vmem:[#allocation8 + $0x50] sm:$0xff] %v883_v52  ;;  %762 = vst [vmem:[#allocation8 + $0x58] sm:$0xff] %v884_v53  ;;  %v400_v58 = vadd.f32 %v399_v54, %v1117_v50  ;;  %v513_v59 = vadd.f32 %v512_v55, %v1119_v51 }
 0x126   :  { %v401_v60 = vpop.f32.mrf.mxu0  ;;  %v514_v61 = vpop.f32.mrf.mxu1 }
 0x127   :  { %v885_v62 = vpack.c.bf16 %v400_v58, %v398_v56  ;;  %v886_v63 = vpack.c.bf16 %v513_v59, %v511_v57  ;;  %v402_v2 = vadd.f32 %v401_v60, %v1113_v48  ;;  %v515_v3 = vadd.f32 %v514_v61, %v1115_v49 }
 0x128   :  { %v403_v0 = vpop.f32.mrf.mxu0  ;;  %v516_v1 = vpop.f32.mrf.mxu1 }
 0x129   :  { %763 = vst [vmem:[#allocation8 + $0x60] sm:$0xff] %v885_v62  ;;  %764 = vst [vmem:[#allocation8 + $0x68] sm:$0xff] %v886_v63  ;;  %v404_v4 = vadd.f32 %v403_v0, %v1117_v50  ;;  %v517_v5 = vadd.f32 %v516_v1, %v1119_v51 }
 0x12a   :  { %v407_v6 = vpop.f32.mrf.mxu0  ;;  %v520_v7 = vpop.f32.mrf.mxu1 }
 0x12b   :  { %v887_v8 = vpack.c.bf16 %v404_v4, %v402_v2  ;;  %v888_v9 = vpack.c.bf16 %v517_v5, %v515_v3  ;;  %v408_v12 = vadd.f32 %v407_v6, %v1113_v48  ;;  %v521_v13 = vadd.f32 %v520_v7, %v1115_v49 }
 0x12c   :  { %v409_v10 = vpop.f32.mrf.mxu0  ;;  %v522_v11 = vpop.f32.mrf.mxu1 }
 0x12d   :  { %765 = vst [vmem:[#allocation8 + $0x70] sm:$0xff] %v887_v8  ;;  %766 = vst [vmem:[#allocation8 + $0x78] sm:$0xff] %v888_v9  ;;  %v410_v14 = vadd.f32 %v409_v10, %v1117_v50  ;;  %v523_v15 = vadd.f32 %v522_v11, %v1119_v51 }
 0x12e   :  { %v411_v16 = vpop.f32.mrf.mxu0  ;;  %v524_v17 = vpop.f32.mrf.mxu1 }
 0x12f   :  { %v889_v18 = vpack.c.bf16 %v410_v14, %v408_v12  ;;  %v890_v19 = vpack.c.bf16 %v523_v15, %v521_v13  ;;  %v412_v22 = vadd.f32 %v411_v16, %v1113_v48  ;;  %v525_v23 = vadd.f32 %v524_v17, %v1115_v49 }
 0x130   :  { %v413_v20 = vpop.f32.mrf.mxu0  ;;  %v526_v21 = vpop.f32.mrf.mxu1 }
 0x131   :  { %767 = vst [vmem:[#allocation8 + $0x80] sm:$0xff] %v889_v18  ;;  %768 = vst [vmem:[#allocation8 + $0x88] sm:$0xff] %v890_v19  ;;  %v414_v24 = vadd.f32 %v413_v20, %v1117_v50  ;;  %v527_v25 = vadd.f32 %v526_v21, %v1119_v51 }
 0x132   :  { %v417_v26 = vpop.f32.mrf.mxu0  ;;  %v530_v27 = vpop.f32.mrf.mxu1 }
 0x133   :  { %v891_v28 = vpack.c.bf16 %v414_v24, %v412_v22  ;;  %v892_v29 = vpack.c.bf16 %v527_v25, %v525_v23  ;;  %v418_v32 = vadd.f32 %v417_v26, %v1113_v48  ;;  %v531_v33 = vadd.f32 %v530_v27, %v1115_v49 }
 0x134   :  { %v419_v30 = vpop.f32.mrf.mxu0  ;;  %v532_v31 = vpop.f32.mrf.mxu1 }
 0x135   :  { %769 = vst [vmem:[#allocation8 + $0x90] sm:$0xff] %v891_v28  ;;  %770 = vst [vmem:[#allocation8 + $0x98] sm:$0xff] %v892_v29  ;;  %v420_v34 = vadd.f32 %v419_v30, %v1117_v50  ;;  %v533_v35 = vadd.f32 %v532_v31, %v1119_v51 }
 0x136   :  { %v421_v36 = vpop.f32.mrf.mxu0  ;;  %v534_v37 = vpop.f32.mrf.mxu1 }
 0x137   :  { %v893_v38 = vpack.c.bf16 %v420_v34, %v418_v32  ;;  %v894_v39 = vpack.c.bf16 %v533_v35, %v531_v33  ;;  %v422_v42 = vadd.f32 %v421_v36, %v1113_v48  ;;  %v535_v43 = vadd.f32 %v534_v37, %v1115_v49 }
 0x138   :  { %v423_v40 = vpop.f32.mrf.mxu0  ;;  %v536_v41 = vpop.f32.mrf.mxu1 }
 0x139   :  { %771 = vst [vmem:[#allocation8 + $0xa0] sm:$0xff] %v893_v38  ;;  %772 = vst [vmem:[#allocation8 + $0xa8] sm:$0xff] %v894_v39  ;;  %v424_v44 = vadd.f32 %v423_v40, %v1117_v50  ;;  %v537_v45 = vadd.f32 %v536_v41, %v1119_v51 }
 0x13a   :  { %v427_v46 = vpop.f32.mrf.mxu0  ;;  %v540_v47 = vpop.f32.mrf.mxu1 }
 0x13b   :  { %v895_v52 = vpack.c.bf16 %v424_v44, %v422_v42  ;;  %v896_v53 = vpack.c.bf16 %v537_v45, %v535_v43  ;;  %v428_v56 = vadd.f32 %v427_v46, %v1113_v48  ;;  %v541_v57 = vadd.f32 %v540_v47, %v1115_v49 }
 0x13c   :  { %v429_v54 = vpop.f32.mrf.mxu0  ;;  %v542_v55 = vpop.f32.mrf.mxu1 }
 0x13d   :  { %773 = vst [vmem:[#allocation8 + $0xb0] sm:$0xff] %v895_v52  ;;  %774 = vst [vmem:[#allocation8 + $0xb8] sm:$0xff] %v896_v53  ;;  %v430_v58 = vadd.f32 %v429_v54, %v1117_v50  ;;  %v543_v59 = vadd.f32 %v542_v55, %v1119_v51 }
 0x13e   :  { %v431_v60 = vpop.f32.mrf.mxu0  ;;  %v544_v61 = vpop.f32.mrf.mxu1 }
 0x13f   :  { %v897_v62 = vpack.c.bf16 %v430_v58, %v428_v56  ;;  %v898_v63 = vpack.c.bf16 %v543_v59, %v541_v57  ;;  %v432_v2 = vadd.f32 %v431_v60, %v1113_v48  ;;  %v545_v3 = vadd.f32 %v544_v61, %v1115_v49 }
 0x140   :  { %v433_v0 = vpop.f32.mrf.mxu0  ;;  %v546_v1 = vpop.f32.mrf.mxu1 }
 0x141   :  { %775 = vst [vmem:[#allocation8 + $0xc0] sm:$0xff] %v897_v62  ;;  %776 = vst [vmem:[#allocation8 + $0xc8] sm:$0xff] %v898_v63  ;;  %v434_v4 = vadd.f32 %v433_v0, %v1117_v50  ;;  %v547_v5 = vadd.f32 %v546_v1, %v1119_v51 }
 0x142   :  { %v437_v6 = vpop.f32.mrf.mxu0  ;;  %v550_v7 = vpop.f32.mrf.mxu1 }
 0x143   :  { %v899_v8 = vpack.c.bf16 %v434_v4, %v432_v2  ;;  %v900_v9 = vpack.c.bf16 %v547_v5, %v545_v3  ;;  %v438_v12 = vadd.f32 %v437_v6, %v1113_v48  ;;  %v551_v13 = vadd.f32 %v550_v7, %v1115_v49 }
 0x144   :  { %v439_v10 = vpop.f32.mrf.mxu0  ;;  %v552_v11 = vpop.f32.mrf.mxu1 }
 0x145   :  { %777 = vst [vmem:[#allocation8 + $0xd0] sm:$0xff] %v899_v8  ;;  %778 = vst [vmem:[#allocation8 + $0xd8] sm:$0xff] %v900_v9  ;;  %v440_v14 = vadd.f32 %v439_v10, %v1117_v50  ;;  %v553_v15 = vadd.f32 %v552_v11, %v1119_v51 }
 0x146   :  { %v441_v16 = vpop.f32.mrf.mxu0  ;;  %v554_v17 = vpop.f32.mrf.mxu1 }
 0x147   :  { %v901_v18 = vpack.c.bf16 %v440_v14, %v438_v12  ;;  %v902_v19 = vpack.c.bf16 %v553_v15, %v551_v13  ;;  %v442_v22 = vadd.f32 %v441_v16, %v1113_v48  ;;  %v555_v23 = vadd.f32 %v554_v17, %v1115_v49 }
 0x148   :  { %v443_v20 = vpop.f32.mrf.mxu0  ;;  %v556_v21 = vpop.f32.mrf.mxu1 }
 0x149   :  { %779 = vst [vmem:[#allocation8 + $0xe0] sm:$0xff] %v901_v18  ;;  %780 = vst [vmem:[#allocation8 + $0xe8] sm:$0xff] %v902_v19  ;;  %v444_v24 = vadd.f32 %v443_v20, %v1117_v50  ;;  %v557_v25 = vadd.f32 %v556_v21, %v1119_v51 }
 0x14b   :  { %v903_v26 = vpack.c.bf16 %v444_v24, %v442_v22  ;;  %v904_v27 = vpack.c.bf16 %v557_v25, %v555_v23 }
 0x14d   :  { %781 = vst [vmem:[#allocation8 + $0xf0] sm:$0xff] %v903_v26  ;;  %782 = vst [vmem:[#allocation8 + $0xf8] sm:$0xff] %v904_v27 }
 0x14e   :  { %1041 = shalt.err (!%p1038_p5)
}
 0x14f   :  { %794 = dma.vmem_to_hbm [thread:$0]  %s789_s2, 4096, %s1194_s3, [#allocation4], %s1057_s15, %s1057_s15, %s1058_s16  }
 0x150   :  { %1054 = dma.done.wait [#allocation4], 4096  }
 0x151   :  { %1055 = vsyncadd [#allocation4], 4294963200 }
 0x152   :  { %798 = vsyncpa [#allocation3], 1 }
 0x153   :  { %799 = vsyncpa [#allocation6], 1 }
 0x154   :  { %800 = vsyncpa [#allocation4], 1 }

</bundles_post_ra>
